<compile_context>
chip_gen: v7x
topology: tpu7x:2x2x1
jax: 0.10.0
libtpu: 0.0.40
codegen_flags: <defaults>
</compile_context>

<pallas_src>
import math
import functools

import jax
import jax.numpy as jnp
from jax.experimental import pallas as pl
from jax.experimental.pallas import tpu as pltpu

D_MODEL = 8
MAX_LENGTH = 10
DROPOUT_P = 0.1


def make_pe_table(d_model: int, max_length: int) -> jnp.ndarray:
    """Sinusoidal positional-encoding table, shape (1, max_length, d_model)."""
    k = jnp.arange(max_length, dtype=jnp.float32)[:, None]                  # (L, 1)
    div_term = jnp.exp(
        jnp.arange(0, d_model, 2, dtype=jnp.float32)
        * -(math.log(10000.0) / d_model)
    )                                                                       # (d_model/2,)
    pe = jnp.zeros((max_length, d_model), dtype=jnp.float32)
    pe = pe.at[:, 0::2].set(jnp.sin(k * div_term))
    pe = pe.at[:, 1::2].set(jnp.cos(k * div_term))
    return pe[None, :, :]                                                   # (1, L, D)


# ----------------------------------------------------------------------------
# Kernels  (operate on the flattened (rows=B, cols=S*D) view)
# ----------------------------------------------------------------------------
def _fmix32(h):
    """murmur3 finalizer: cheap, well-mixed 32-bit hash (all VPU int ops)."""
    h = (h ^ (h >> jnp.uint32(16))) * jnp.uint32(0x85EBCA6B)
    h = (h ^ (h >> jnp.uint32(13))) * jnp.uint32(0xC2B2AE35)
    h = h ^ (h >> jnp.uint32(16))
    return h


def _pe_dropout_kernel(seed_ref, x_ref, pe_ref, o_ref, *, p: float, total_cols: int):
    """out = inverted_dropout(x + pe, p). Mask = hash(global element index, seed)."""
    tb, tc = x_ref.shape
    y = x_ref[...] + pe_ref[...]                       # (tb, tc) + (1, tc) broadcast

    # Global element index (independent of tiling) -> per-tile-unique random bits.
    r = jax.lax.broadcasted_iota(jnp.int32, (tb, tc), 0)
    c = jax.lax.broadcasted_iota(jnp.int32, (tb, tc), 1)
    g_row = pl.program_id(1) * tb + r                  # grid axis 1 = row tiles (inner)
    g_col = pl.program_id(0) * tc + c                  # grid axis 0 = col tiles (outer)
    flat = (g_row * total_cols + g_col).astype(jnp.uint32)

    seed_u32 = seed_ref[0].astype(jnp.uint32) * jnp.uint32(0x9E3779B9)
    bits = _fmix32(flat ^ seed_u32)

    # Single integer threshold compare:  P(drop) = p.
    threshold = jnp.uint32(min(int(round(p * 2.0 ** 32)), 2 ** 32 - 1))
    keep = bits >= threshold
    scale = jnp.float32(1.0 / (1.0 - p))
    o_ref[...] = jnp.where(keep, y * scale, jnp.float32(0.0)).astype(o_ref.dtype)


def _pe_add_kernel(x_ref, pe_ref, o_ref):
    """Eval mode: out = x + pe (dropout is identity)."""
    o_ref[...] = (x_ref[...] + pe_ref[...]).astype(o_ref.dtype)


# ----------------------------------------------------------------------------
# Wrapper
# ----------------------------------------------------------------------------
def _pick_tiles(rows: int, cols: int, row_target: int, col_target: int):
    """Tile sizes obeying the (8, 128) rule: divisible or equal-to-full-dim."""
    if cols % 128 != 0 or cols <= col_target:
        tc = cols
    else:
        tc = max(128, (min(col_target, cols) // 128) * 128)
    if rows % 8 != 0 or rows <= row_target:
        tb = rows
    else:
        tb = max(8, (min(row_target, rows) // 8) * 8)
    return tb, tc


def _build_grid_spec(rows, cols, tb, tc, num_scalar_prefetch):
    # Grid = (col tiles, row tiles): rightmost (row) axis iterates fastest, so the
    # PE block index (0, j) is unchanged across the inner loop -> PE stays in VMEM.
    grid = (pl.cdiv(cols, tc), pl.cdiv(rows, tb))
    x_spec = pl.BlockSpec((tb, tc), lambda j, i, *_: (i, j))
    pe_spec = pl.BlockSpec((1, tc), lambda j, i, *_: (0, j))
    out_spec = pl.BlockSpec((tb, tc), lambda j, i, *_: (i, j))
    return pltpu.PrefetchScalarGridSpec(
        num_scalar_prefetch=num_scalar_prefetch,
        grid=grid,
        in_specs=[x_spec, pe_spec],
        out_specs=out_spec,
    )


def positional_encoding(x: jnp.ndarray,
                        pe_table: jnp.ndarray,
                        *,
                        dropout_p: float = DROPOUT_P,
                        training: bool = True,
                        seed: int = 0,
                        row_tile: int = 256,
                        col_tile: int = 2048) -> jnp.ndarray:
    """x: (B, S, D). pe_table: (1, max_length, D).  Returns dropout(x + pe[:, :S])."""
    B, S, D = x.shape
    assert pe_table.shape[2] == D and pe_table.shape[1] >= S

    # Lane-dense 2-D view: rows = batch, lanes = S*D (PE broadcast over rows).
    rows, cols = B, S * D
    xf = x.reshape(rows, cols)
    pef = pe_table[:, :S, :].reshape(1, cols)

    tb, tc = _pick_tiles(rows, cols, row_tile, col_tile)
    out_shape = jax.ShapeDtypeStruct((rows, cols), x.dtype)
    cparams = pltpu.CompilerParams(
        dimension_semantics=("parallel", "parallel"),   # shard across v7x's 2 TCs; harmless on v5e/v6e
        vmem_limit_bytes=32 * 1024 * 1024,              # tiles (<=2 MiB each, double-buffered) fit easily
    )

    if training and dropout_p > 0.0:
        seed_arr = jnp.asarray([seed], dtype=jnp.int32)
        kernel = functools.partial(_pe_dropout_kernel, p=float(dropout_p), total_cols=cols)
        out2 = pl.pallas_call(
            kernel,
            out_shape=out_shape,
            grid_spec=_build_grid_spec(rows, cols, tb, tc, num_scalar_prefetch=1),
            compiler_params=cparams,
        )(seed_arr, xf, pef)
    else:
        # TODO(synk): for eval a fused XLA `x + pe` is already at the HBM roofline;
        # the Pallas path is kept for a uniform code path / demonstration.
        out2 = pl.pallas_call(
            _pe_add_kernel,
            out_shape=out_shape,
            grid_spec=_build_grid_spec(rows, cols, tb, tc, num_scalar_prefetch=0),
            compiler_params=cparams,
        )(xf, pef)

    return out2.reshape(B, S, D)


if __name__ == "__main__":
    key = jax.random.PRNGKey(0)
    B, S = 2, 8                                          # small shapes; S <= MAX_LENGTH
    x = jax.random.normal(key, (B, S, D_MODEL), dtype=jnp.float32)
    pe_table = make_pe_table(D_MODEL, MAX_LENGTH)

    # --- Eval mode (dropout identity): check against plain-JAX reference. ---
    out_eval = jax.block_until_ready(positional_encoding(x, pe_table, training=False))
    ref_eval = x + pe_table[:, :S, :]
    assert jnp.allclose(out_eval, ref_eval, atol=1e-6), "eval-mode mismatch"

    # --- Training mode (inverted dropout): kept entries must equal (x+pe)/(1-p). ---
    out_train = jax.block_until_ready(positional_encoding(x, pe_table, training=True, seed=42))
    assert out_train.shape == (B, S, D_MODEL)
    scale = 1.0 / (1.0 - DROPOUT_P)
    kept = out_train != 0
    assert jnp.allclose(jnp.where(kept, out_train, 0.0),
                        jnp.where(kept, ref_eval * scale, 0.0), atol=1e-5), "train-mode mismatch"

    # --- Tiling invariance of the dropout mask (exercises a multi-block grid). ---
    x2 = jax.random.normal(jax.random.PRNGKey(1), (16, S, D_MODEL), dtype=jnp.float32)
    out_a = jax.block_until_ready(positional_encoding(x2, pe_table, training=True, seed=7))
    out_b = jax.block_until_ready(
        positional_encoding(x2, pe_table, training=True, seed=7, row_tile=8))  # grid of 2 row tiles
    assert jnp.allclose(out_a, out_b, atol=1e-6), "mask not tiling-invariant"

    print("KERNEL_OK")
</pallas_src>

<mosaic_0001>
module attributes {stable_mosaic.version = 11 : i64} {
  func.func @_pe_add_kernel(%arg0: i32, %arg1: i32, %arg2: memref<2x64xf32, #tpu.memory_space<vmem>>, %arg3: memref<1x64xf32, #tpu.memory_space<vmem>>, %arg4: memref<2x64xf32, #tpu.memory_space<vmem>>) attributes {dimension_semantics = [#tpu.dimension_semantics<parallel>, #tpu.dimension_semantics<parallel>], iteration_bounds = array<i64: 1, 1>, scalar_prefetch = 0 : i64, scratch_operands = 0 : i64, tpu.core_type = #tpu.core_type<tc>, window_params = [{transform_indices = @transform_0, window_bounds = array<i64: 2, 64>}, {transform_indices = @transform_1, window_bounds = array<i64: 1, 64>}, {transform_indices = @transform_2, window_bounds = array<i64: 2, 64>}]} {
    %c0 = arith.constant 0 : index
    %c0_0 = arith.constant 0 : index
    %0 = vector.load %arg2[%c0, %c0_0] : memref<2x64xf32, #tpu.memory_space<vmem>>, vector<2x64xf32>
    %c0_1 = arith.constant 0 : index
    %c0_2 = arith.constant 0 : index
    %1 = vector.load %arg3[%c0_1, %c0_2] : memref<1x64xf32, #tpu.memory_space<vmem>>, vector<1x64xf32>
    %2 = vector.broadcast %1 : vector<1x64xf32> to vector<2x64xf32>
    %3 = arith.addf %0, %2 : vector<2x64xf32>
    %c0_3 = arith.constant 0 : index
    %c0_4 = arith.constant 0 : index
    %4 = vector.load %arg4[%c0_3, %c0_4] : memref<2x64xf32, #tpu.memory_space<vmem>>, vector<2x64xf32>
    tpu.vector_store %arg4[%c0_3, %c0_4], %3 {strides = array<i32>} : memref<2x64xf32, #tpu.memory_space<vmem>>, vector<2x64xf32>,
    return
  }
  func.func @transform_0(%arg0: i32, %arg1: i32) -> (i32, i32) {
    %c0_i32 = arith.constant 0 : i32
    return %arg1, %arg0 : i32, i32
  }
  func.func @transform_1(%arg0: i32, %arg1: i32) -> (i32, i32) {
    %c0_i32 = arith.constant 0 : i32
    %c0_i32_0 = arith.constant 0 : i32
    return %c0_i32, %arg0 : i32, i32
  }
  func.func @transform_2(%arg0: i32, %arg1: i32) -> (i32, i32) {
    %c0_i32 = arith.constant 0 : i32
    return %arg1, %arg0 : i32, i32
  }
}

</mosaic_0001>

<bundles_post_ra>
// kernel: tpu_custom_call.1
= control target key start
LH: loop header
LB: loop body
LE: loop exit
PB: predicated region body
PF: predicated region fallthrough
CT: control target
= control target key end

     0   :  { %7 = vsyncpa [#allocation3], 0  ;;  %s145_s0 = inlined_call_operand.hbm [shape: f32[2,64], index: 0, kind: input, shape index: {}]   ;;  %s146_s1 = inlined_call_operand.vmem [shape: f32[1,64], index: 1, kind: input, shape index: {}]   ;;  %s147_s2 = inlined_call_operand.hbm [shape: f32[2,64], index: 2, kind: output, shape index: {}]  }
   0x1   :  { %8 = vsyncpa [#allocation4], 0  ;;  %s101_s9 = smov [#allocation2]   ;;  %s53_s13 = scalar_lea.hbm %s145_s0, 32 }
   0x2   :  { %s15_s10 = sshll.u32 %s101_s9, 4  ;;  %p54_p0 = scmp.ne.s32.totalorder %s145_s0, %s53_s13  ;;  %s16_s10 = int_to_ptr.vmem [resolvable:$true] %s15_s10 }
   0x3   :  { %p57_p1 = scmp.lt.u32.totalorder %s53_s13, %s145_s0 }
   0x5   :  { %p59_p2 = pnand %p57_p1, %p54_p0 }
   0x7   :  { %62 = shalt.err (!%p59_p2)
}
   0x8   :  { %s63_s18 = scalar_lea.vmem %s16_s10, 32  ;;  %p68_p4 = scmp.lt.s32.totalorder %s16_s10, %s16_s10 }
   0x9   :  { %p64_p3 = scmp.ne.s32.totalorder %s16_s10, %s63_s18  ;;  %p69_p5 = scmp.lt.s32.totalorder %s63_s18, %s63_s18 }
   0xb   :  { %p70_p6 = por %p69_p5, %p68_p4 }
   0xd   :  { %p71_p7 = pnand %p70_p6, %p64_p3 }
   0xf   :  { %74 = shalt.err (!%p71_p7)
}
  0x10   :  { %18 = dma.hbm_to_vmem [thread:$0]  %s145_s0, 32, %s16_s10, [#allocation3]  }
  0x11   :  { %97 = dma.done.wait [#allocation3], 32  }
  0x12   :  { %98 = vsyncadd [#allocation3], 4294967264  ;;  %s102_s21 = smov [#allocation5]   ;;  %v24_v0 = vld [vmem:[#allocation2] sm:$0x3]  ;;  %vm33_vm0 = vcmask 517120  }
  0x13   :  { %s41_s22 = sshll.u32 %s102_s21, 4  ;;  %v50_v1 = vld [vmem:[%s146_s1] ss:$0 sm:$0xff]  ;;  %s42_s22 = int_to_ptr.vmem [resolvable:$true] %s41_s22 }
  0x14   :  { %v32_v2 = vadd.f32 %v50_v1, %v24_v0  ;;  %s75_s25 = scalar_lea.vmem %s42_s22, 32  ;;  %p80_p9 = scmp.lt.s32.totalorder %s42_s22, %s42_s22 }
  0x15   :  { %p76_p8 = scmp.ne.s32.totalorder %s42_s22, %s75_s25  ;;  %p81_p10 = scmp.lt.s32.totalorder %s75_s25, %s75_s25 }
  0x16   :  { %34 = vst.msk [vmem:[#allocation5] sm:$0x3] %vm33_vm0, %v32_v2 }
  0x17   :  { %p82_p11 = por %p81_p10, %p80_p9 }
  0x19   :  { %p83_p12 = pnand %p82_p11, %p76_p8 }
  0x1b   :  { %86 = shalt.err (!%p83_p12)
}
  0x1c   :  { %s87_s27 = scalar_lea.hbm %s147_s2, 32 }
  0x1d   :  { %p88_p13 = scmp.ne.s32.totalorder %s147_s2, %s87_s27  ;;  %p91_p0 = scmp.lt.u32.totalorder %s87_s27, %s147_s2 }
  0x1f   :  { %p93_p1 = pnand %p91_p0, %p88_p13 }
  0x21   :  { %96 = shalt.err (!%p93_p1)
}
  0x22   :  { %44 = dma.vmem_to_hbm [thread:$0]  %s42_s22, 32, %s147_s2, [#allocation4]  }
  0x23   :  { %99 = dma.done.wait [#allocation4], 32  }
  0x24   :  { %100 = vsyncadd [#allocation4], 4294967264 }
  0x25   :  { %48 = vsyncpa [#allocation3], 1 }
  0x26   :  { %49 = vsyncpa [#allocation4], 1 }

</bundles_post_ra>
